<compile_context>
chip_gen: v5e
topology: v5e:2x2
jax: 0.10.0
libtpu: 0.0.40
codegen_flags: <defaults>
</compile_context>

<pallas_src>
import functools

import jax
import jax.numpy as jnp
from jax.experimental import pallas as pl
from jax.experimental.pallas import tpu as pltpu


def _round_up(n, m):
    return ((n + m - 1) // m) * m


def _ae_kernel(x_ref, w1_ref, b1_ref, w2_ref, b2_ref,
               w3_ref, b3_ref, w4_ref, b4_ref,
               o_ref, h1_ref, h2_ref, *, use_bf16):
    """Fused encoder+decoder MLP: 4 matmuls + biases + ReLUs in one kernel.

    MXU operands are bf16 (if use_bf16) while accumulation, bias add and ReLU
    stay in f32. h1/h2 are staged through VMEM scratch.
    """
    cdt = jnp.bfloat16 if use_bf16 else jnp.float32
    x = x_ref[...].astype(cdt)

    # encoder layer 1: (bb, Dp) @ (Dp, Hp) -> f32
    h1 = jnp.dot(x, w1_ref[...], preferred_element_type=jnp.float32) + b1_ref[...]
    h1_ref[...] = jnp.maximum(h1, 0.0).astype(h1_ref.dtype)

    # encoder layer 2: (bb, Hp) @ (Hp, Lp) -> f32
    z = jnp.dot(h1_ref[...].astype(cdt), w2_ref[...],
                preferred_element_type=jnp.float32) + b2_ref[...]

    # decoder layer 1: (bb, Lp) @ (Lp, Hp) -> f32
    h2 = jnp.dot(z.astype(cdt), w3_ref[...],
                 preferred_element_type=jnp.float32) + b3_ref[...]
    h2_ref[...] = jnp.maximum(h2, 0.0).astype(h2_ref.dtype)

    # decoder layer 2: (bb, Hp) @ (Hp, Dp) -> f32
    out = jnp.dot(h2_ref[...].astype(cdt), w4_ref[...],
                  preferred_element_type=jnp.float32) + b4_ref[...]
    o_ref[...] = out.astype(o_ref.dtype)


def _const_spec(shape):
    """BlockSpec for a grid-invariant (fully resident) operand.

    Single-buffered (pl.Buffered(1)) since its block index never changes;
    falls back to the default if pipeline_mode is not supported.
    """
    ndim = len(shape)
    index_map = lambda i: (0,) * ndim
    if hasattr(pl, "Buffered"):
        try:
            return pl.BlockSpec(shape, index_map, pipeline_mode=pl.Buffered(1))
        except TypeError:
            pass
    return pl.BlockSpec(shape, index_map)


@functools.partial(jax.jit, static_argnames=("block_b", "use_bf16"))
def hybrid_autoencoder_forward(x, params, block_b=128, use_bf16=True):
    """Fused autoencoder forward pass with a Pallas TPU kernel.

    x: (B, input_dim) float32
    params: dict of weights (in, out) f32 and biases (1, out) f32
    """
    B, D = x.shape
    w1, b1 = params["w1"], params["b1"]   # (D, H), (1, H)
    w2, b2 = params["w2"], params["b2"]   # (H, L), (1, L)
    w3, b3 = params["w3"], params["b3"]   # (L, H), (1, H)
    w4, b4 = params["w4"], params["b4"]   # (H, D), (1, D)
    H = w1.shape[1]
    L = w2.shape[1]

    # ---- lane-dense padding of all feature dims (exact: zero rows/cols) ----
    Dp = _round_up(D, 128)
    Hp = _round_up(H, 128)
    Lp = _round_up(L, 128)

    def pad2(a, r, c):
        return jnp.pad(a, ((0, r - a.shape[0]), (0, c - a.shape[1])))

    wdt = jnp.bfloat16 if use_bf16 else x.dtype
    w1p = pad2(w1, Dp, Hp).astype(wdt)
    w2p = pad2(w2, Hp, Lp).astype(wdt)
    w3p = pad2(w3, Lp, Hp).astype(wdt)
    w4p = pad2(w4, Hp, Dp).astype(wdt)
    b1p = pad2(b1, 1, Hp)
    b2p = pad2(b2, 1, Lp)
    b3p = pad2(b3, 1, Hp)
    b4p = pad2(b4, 1, Dp)

    # ---- batch tiling: >=128 rows per MXU call, pad batch to tile multiple ----
    bb = int(max(8, min(block_b, _round_up(B, 128))))
    Bp = _round_up(B, bb)
    xp = pad2(x, Bp, Dp)

    grid = (Bp // bb,)
    cdt = jnp.bfloat16 if use_bf16 else jnp.float32

    out = pl.pallas_call(
        functools.partial(_ae_kernel, use_bf16=use_bf16),
        out_shape=jax.ShapeDtypeStruct((Bp, Dp), x.dtype),
        grid_spec=pltpu.PrefetchScalarGridSpec(
            num_scalar_prefetch=0,
            grid=grid,
            in_specs=[
                pl.BlockSpec((bb, Dp), lambda i: (i, 0)),   # x tile over batch
                _const_spec((Dp, Hp)), _const_spec((1, Hp)),
                _const_spec((Hp, Lp)), _const_spec((1, Lp)),
                _const_spec((Lp, Hp)), _const_spec((1, Hp)),
                _const_spec((Hp, Dp)), _const_spec((1, Dp)),
            ],
            out_specs=pl.BlockSpec((bb, Dp), lambda i: (i, 0)),
            scratch_shapes=[
                pltpu.VMEM((bb, Hp), cdt),   # h1 staging
                pltpu.VMEM((bb, Hp), cdt),   # h2 staging
            ],
        ),
        compiler_params=pltpu.CompilerParams(
            dimension_semantics=("parallel",)),
    )(xp, w1p, b1p, w2p, b2p, w3p, b3p, w4p, b4p)

    return out[:B, :D]


def init_params(key, input_dim, latent_dim=64, hidden=256):
    """Deterministic init mimicking torch.nn.Linear default U(-1/sqrt(fan_in), +)."""
    keys = jax.random.split(key, 8)

    def linear(kw, kb, fan_in, fan_out):
        bound = 1.0 / jnp.sqrt(fan_in)
        w = jax.random.uniform(kw, (fan_in, fan_out), jnp.float32, -bound, bound)
        b = jax.random.uniform(kb, (1, fan_out), jnp.float32, -bound, bound)
        return w, b

    w1, b1 = linear(keys[0], keys[1], input_dim, hidden)
    w2, b2 = linear(keys[2], keys[3], hidden, latent_dim)
    w3, b3 = linear(keys[4], keys[5], latent_dim, hidden)
    w4, b4 = linear(keys[6], keys[7], hidden, input_dim)
    return dict(w1=w1, b1=b1, w2=w2, b2=b2, w3=w3, b3=b3, w4=w4, b4=b4)


def reference_forward(x, p):
    h1 = jnp.maximum(x @ p["w1"] + p["b1"], 0.0)
    z = h1 @ p["w2"] + p["b2"]
    h2 = jnp.maximum(z @ p["w3"] + p["b3"], 0.0)
    return h2 @ p["w4"] + p["b4"]


if __name__ == "__main__":
    key = jax.random.PRNGKey(0)
    k_x, k_p = jax.random.split(key)

    B, INPUT_DIM, LATENT_DIM = 256, 128, 64
    x = jax.random.normal(k_x, (B, INPUT_DIM), dtype=jnp.float32)
    params = init_params(k_p, INPUT_DIM, LATENT_DIM)

    ref = reference_forward(x, params)

    # f32 path: tight validation against the JAX reference.
    out_f32 = hybrid_autoencoder_forward(x, params, block_b=128, use_bf16=False)
    out_f32 = jax.block_until_ready(out_f32)
    assert out_f32.shape == (B, INPUT_DIM)
    assert jnp.allclose(out_f32, ref, atol=1e-4, rtol=1e-4)

    # bf16-MXU path (default, fast): loose tolerance vs the f32 reference.
    out_bf16 = hybrid_autoencoder_forward(x, params, block_b=128, use_bf16=True)
    out_bf16 = jax.block_until_ready(out_bf16)
    assert out_bf16.shape == (B, INPUT_DIM)
    assert jnp.allclose(out_bf16, ref, atol=5e-2, rtol=5e-2)

    print("KERNEL_OK")
</pallas_src>

<mosaic_0001>
module attributes {stable_mosaic.version = 11 : i64} {
  func.func @_ae_kernel(%arg0: i32, %arg1: memref<128x128xf32, #tpu.memory_space<vmem>>, %arg2: memref<128x256xf32, #tpu.memory_space<vmem>>, %arg3: memref<1x256xf32, #tpu.memory_space<vmem>>, %arg4: memref<256x128xf32, #tpu.memory_space<vmem>>, %arg5: memref<1x128xf32, #tpu.memory_space<vmem>>, %arg6: memref<128x256xf32, #tpu.memory_space<vmem>>, %arg7: memref<1x256xf32, #tpu.memory_space<vmem>>, %arg8: memref<256x128xf32, #tpu.memory_space<vmem>>, %arg9: memref<1x128xf32, #tpu.memory_space<vmem>>, %arg10: memref<128x128xf32, #tpu.memory_space<vmem>>, %arg11: memref<128x256xf32, #tpu.memory_space<vmem>>, %arg12: memref<128x256xf32, #tpu.memory_space<vmem>>) attributes {dimension_semantics = [#tpu.dimension_semantics<parallel>], iteration_bounds = array<i64: 2>, scalar_prefetch = 0 : i64, scratch_operands = 2 : i64, tpu.core_type = #tpu.core_type<tc>, window_params = [{transform_indices = @transform_0, window_bounds = array<i64: 128, 128>}, {pipeline_mode = #tpu.pipeline_mode<synchronous>, transform_indices = @transform_1, window_bounds = array<i64: 128, 256>}, {pipeline_mode = #tpu.pipeline_mode<synchronous>, transform_indices = @transform_2, window_bounds = array<i64: 1, 256>}, {pipeline_mode = #tpu.pipeline_mode<synchronous>, transform_indices = @transform_3, window_bounds = array<i64: 256, 128>}, {pipeline_mode = #tpu.pipeline_mode<synchronous>, transform_indices = @transform_4, window_bounds = array<i64: 1, 128>}, {pipeline_mode = #tpu.pipeline_mode<synchronous>, transform_indices = @transform_5, window_bounds = array<i64: 128, 256>}, {pipeline_mode = #tpu.pipeline_mode<synchronous>, transform_indices = @transform_6, window_bounds = array<i64: 1, 256>}, {pipeline_mode = #tpu.pipeline_mode<synchronous>, transform_indices = @transform_7, window_bounds = array<i64: 256, 128>}, {pipeline_mode = #tpu.pipeline_mode<synchronous>, transform_indices = @transform_8, window_bounds = array<i64: 1, 128>}, {transform_indices = @transform_9, window_bounds = array<i64: 128, 128>}]} {
    %c0 = arith.constant 0 : index
    %c0_0 = arith.constant 0 : index
    %0 = vector.load %arg1[%c0, %c0_0] : memref<128x128xf32, #tpu.memory_space<vmem>>, vector<128x128xf32>
    %c0_1 = arith.constant 0 : index
    %c0_2 = arith.constant 0 : index
    %1 = vector.load %arg2[%c0_1, %c0_2] : memref<128x256xf32, #tpu.memory_space<vmem>>, vector<128x256xf32>
    %cst = arith.constant dense<0.000000e+00> : vector<128x256xf32>
    %2 = tpu.matmul %0, %1, %cst {dimension_numbers = #tpu.dot_dimension_numbers<[1], [0], [0], [1], [0, 0, 1, 1], [], []>} : vector<128x128xf32>, vector<128x256xf32>, vector<128x256xf32> -> vector<128x256xf32>
    %c0_3 = arith.constant 0 : index
    %c0_4 = arith.constant 0 : index
    %3 = vector.load %arg3[%c0_3, %c0_4] : memref<1x256xf32, #tpu.memory_space<vmem>>, vector<1x256xf32>
    %4 = vector.broadcast %3 : vector<1x256xf32> to vector<128x256xf32>
    %5 = arith.addf %2, %4 : vector<128x256xf32>
    %cst_5 = arith.constant 0.000000e+00 : f32
    %6 = vector.broadcast %cst_5 : f32 to vector<128x256xf32>
    %7 = arith.maximumf %5, %6 : vector<128x256xf32>
    %c0_6 = arith.constant 0 : index
    %c0_7 = arith.constant 0 : index
    %8 = vector.load %arg11[%c0_6, %c0_7] : memref<128x256xf32, #tpu.memory_space<vmem>>, vector<128x256xf32>
    tpu.vector_store %arg11[%c0_6, %c0_7], %7 {strides = array<i32>} : memref<128x256xf32, #tpu.memory_space<vmem>>, vector<128x256xf32>,
    %c0_8 = arith.constant 0 : index
    %c0_9 = arith.constant 0 : index
    %9 = vector.load %arg11[%c0_8, %c0_9] : memref<128x256xf32, #tpu.memory_space<vmem>>, vector<128x256xf32>
    %c0_10 = arith.constant 0 : index
    %c0_11 = arith.constant 0 : index
    %10 = vector.load %arg4[%c0_10, %c0_11] : memref<256x128xf32, #tpu.memory_space<vmem>>, vector<256x128xf32>
    %cst_12 = arith.constant dense<0.000000e+00> : vector<128x128xf32>
    %11 = tpu.matmul %9, %10, %cst_12 {dimension_numbers = #tpu.dot_dimension_numbers<[1], [0], [0], [1], [0, 0, 1, 1], [], []>} : vector<128x256xf32>, vector<256x128xf32>, vector<128x128xf32> -> vector<128x128xf32>
    %c0_13 = arith.constant 0 : index
    %c0_14 = arith.constant 0 : index
    %12 = vector.load %arg5[%c0_13, %c0_14] : memref<1x128xf32, #tpu.memory_space<vmem>>, vector<1x128xf32>
    %13 = vector.broadcast %12 : vector<1x128xf32> to vector<128x128xf32>
    %14 = arith.addf %11, %13 : vector<128x128xf32>
    %c0_15 = arith.constant 0 : index
    %c0_16 = arith.constant 0 : index
    %15 = vector.load %arg6[%c0_15, %c0_16] : memref<128x256xf32, #tpu.memory_space<vmem>>, vector<128x256xf32>
    %cst_17 = arith.constant dense<0.000000e+00> : vector<128x256xf32>
    %16 = tpu.matmul %14, %15, %cst_17 {dimension_numbers = #tpu.dot_dimension_numbers<[1], [0], [0], [1], [0, 0, 1, 1], [], []>} : vector<128x128xf32>, vector<128x256xf32>, vector<128x256xf32> -> vector<128x256xf32>
    %c0_18 = arith.constant 0 : index
    %c0_19 = arith.constant 0 : index
    %17 = vector.load %arg7[%c0_18, %c0_19] : memref<1x256xf32, #tpu.memory_space<vmem>>, vector<1x256xf32>
    %18 = vector.broadcast %17 : vector<1x256xf32> to vector<128x256xf32>
    %19 = arith.addf %16, %18 : vector<128x256xf32>
    %cst_20 = arith.constant 0.000000e+00 : f32
    %20 = vector.broadcast %cst_20 : f32 to vector<128x256xf32>
    %21 = arith.maximumf %19, %20 : vector<128x256xf32>
    %c0_21 = arith.constant 0 : index
    %c0_22 = arith.constant 0 : index
    %22 = vector.load %arg12[%c0_21, %c0_22] : memref<128x256xf32, #tpu.memory_space<vmem>>, vector<128x256xf32>
    tpu.vector_store %arg12[%c0_21, %c0_22], %21 {strides = array<i32>} : memref<128x256xf32, #tpu.memory_space<vmem>>, vector<128x256xf32>,
    %c0_23 = arith.constant 0 : index
    %c0_24 = arith.constant 0 : index
    %23 = vector.load %arg12[%c0_23, %c0_24] : memref<128x256xf32, #tpu.memory_space<vmem>>, vector<128x256xf32>
    %c0_25 = arith.constant 0 : index
    %c0_26 = arith.constant 0 : index
    %24 = vector.load %arg8[%c0_25, %c0_26] : memref<256x128xf32, #tpu.memory_space<vmem>>, vector<256x128xf32>
    %cst_27 = arith.constant dense<0.000000e+00> : vector<128x128xf32>
    %25 = tpu.matmul %23, %24, %cst_27 {dimension_numbers = #tpu.dot_dimension_numbers<[1], [0], [0], [1], [0, 0, 1, 1], [], []>} : vector<128x256xf32>, vector<256x128xf32>, vector<128x128xf32> -> vector<128x128xf32>
    %c0_28 = arith.constant 0 : index
    %c0_29 = arith.constant 0 : index
    %26 = vector.load %arg9[%c0_28, %c0_29] : memref<1x128xf32, #tpu.memory_space<vmem>>, vector<1x128xf32>
    %27 = vector.broadcast %26 : vector<1x128xf32> to vector<128x128xf32>
    %28 = arith.addf %25, %27 : vector<128x128xf32>
    %c0_30 = arith.constant 0 : index
    %c0_31 = arith.constant 0 : index
    %29 = vector.load %arg10[%c0_30, %c0_31] : memref<128x128xf32, #tpu.memory_space<vmem>>, vector<128x128xf32>
    tpu.vector_store %arg10[%c0_30, %c0_31], %28 {strides = array<i32>} : memref<128x128xf32, #tpu.memory_space<vmem>>, vector<128x128xf32>,
    return
  }
  func.func @transform_0(%arg0: i32) -> (i32, i32) {
    %c0_i32 = arith.constant 0 : i32
    %c0_i32_0 = arith.constant 0 : i32
    return %arg0, %c0_i32 : i32, i32
  }
  func.func @transform_1(%arg0: i32) -> (i32, i32) {
    %c0_i32 = arith.constant 0 : i32
    %c0_i32_0 = arith.constant 0 : i32
    %c0_i32_1 = arith.constant 0 : i32
    return %c0_i32, %c0_i32_0 : i32, i32
  }
  func.func @transform_2(%arg0: i32) -> (i32, i32) {
    %c0_i32 = arith.constant 0 : i32
    %c0_i32_0 = arith.constant 0 : i32
    %c0_i32_1 = arith.constant 0 : i32
    return %c0_i32, %c0_i32_0 : i32, i32
  }
  func.func @transform_3(%arg0: i32) -> (i32, i32) {
    %c0_i32 = arith.constant 0 : i32
    %c0_i32_0 = arith.constant 0 : i32
    %c0_i32_1 = arith.constant 0 : i32
    return %c0_i32, %c0_i32_0 : i32, i32
  }
  func.func @transform_4(%arg0: i32) -> (i32, i32) {
    %c0_i32 = arith.constant 0 : i32
    %c0_i32_0 = arith.constant 0 : i32
    %c0_i32_1 = arith.constant 0 : i32
    return %c0_i32, %c0_i32_0 : i32, i32
  }
  func.func @transform_5(%arg0: i32) -> (i32, i32) {
    %c0_i32 = arith.constant 0 : i32
    %c0_i32_0 = arith.constant 0 : i32
    %c0_i32_1 = arith.constant 0 : i32
    return %c0_i32, %c0_i32_0 : i32, i32
  }
  func.func @transform_6(%arg0: i32) -> (i32, i32) {
    %c0_i32 = arith.constant 0 : i32
    %c0_i32_0 = arith.constant 0 : i32
    %c0_i32_1 = arith.constant 0 : i32
    return %c0_i32, %c0_i32_0 : i32, i32
  }
  func.func @transform_7(%arg0: i32) -> (i32, i32) {
    %c0_i32 = arith.constant 0 : i32
    %c0_i32_0 = arith.constant 0 : i32
    %c0_i32_1 = arith.constant 0 : i32
    return %c0_i32, %c0_i32_0 : i32, i32
  }
  func.func @transform_8(%arg0: i32) -> (i32, i32) {
    %c0_i32 = arith.constant 0 : i32
    %c0_i32_0 = arith.constant 0 : i32
    %c0_i32_1 = arith.constant 0 : i32
    return %c0_i32, %c0_i32_0 : i32, i32
  }
  func.func @transform_9(%arg0: i32) -> (i32, i32) {
    %c0_i32 = arith.constant 0 : i32
    %c0_i32_0 = arith.constant 0 : i32
    return %arg0, %c0_i32 : i32, i32
  }
}

</mosaic_0001>

<bundles_post_ra>
// kernel: hybrid_autoencoder_forward.1
= control target key start
LH: loop header
LB: loop body
LE: loop exit
PB: predicated region body
PF: predicated region fallthrough
CT: control target
= control target key end

     0   :  { %14 = vsyncpa [#allocation5], 0  ;;  %s2105_s0 = inlined_call_operand.vmem [shape: f32[256,128], index: 0, kind: input, shape index: {}]   ;;  %s2106_s1 = inlined_call_operand.vmem [shape: f32[128,256], index: 1, kind: input, shape index: {}]   ;;  %s2107_s2 = inlined_call_operand.vmem [shape: f32[1,256], index: 2, kind: input, shape index: {}]   ;;  %s2108_s3 = inlined_call_operand.vmem [shape: f32[256,128], index: 3, kind: input, shape index: {}]   ;;  %s2109_s4 = inlined_call_operand.vmem [shape: f32[1,128], index: 4, kind: input, shape index: {}]   ;;  %s2110_s5 = inlined_call_operand.vmem [shape: f32[128,256], index: 5, kind: input, shape index: {}]   ;;  %s2111_s6 = inlined_call_operand.vmem [shape: f32[1,256], index: 6, kind: input, shape index: {}]   ;;  %s2112_s7 = inlined_call_operand.vmem [shape: f32[256,128], index: 7, kind: input, shape index: {}]   ;;  %s2113_s8 = inlined_call_operand.vmem [shape: f32[1,128], index: 8, kind: input, shape index: {}]   ;;  %s2114_s9 = inlined_call_operand.hbm [shape: f32[256,128], index: 9, kind: output, shape index: {}]  }
   0x1   :  { %16 = vsyncpa [#allocation5 + $0x1], 0  ;;  %s1476_s30 = smov 0   ;;  %s1478_s10 = smov 0  }
   0x2   :  { %s1480_s11 = smov 0   ;;  %s1482_s12 = smov 0  }
   0x3 LB: > { %s1497_s13 = sadd.s32 4294967295, %s1422_s12   ;;  %s1304_s14 = sadd.s32 4294967294, %s1422_s12   ;;  %s1422_s12 = sphi %s1482_s12, %s2120_s12   ;;  %s1418_s11 = sphi %s1480_s11, %s2119_s11   ;;  %s1414_s10 = sphi %s1478_s10, %s2118_s10   ;;  %s1410_s30 = sphi %s1476_s30, %s2117_s30  }
   0x4   : > { %s1501_s15 = sadd.s32 1, %s1422_s12   ;;  %s223_s16 = sadd.s32 1, %s1418_s11 }
   0x5   : > { %s220_s17 = ssub.s32 %s1422_s12, %s1501_s15  ;;  %p233_p0 = scmp.ne.s32.totalorder %s1418_s11, %s1414_s10 }
   0x6   : > { %p221_p1 = scmp.eq.s32.totalorder %s220_s17, 0  ;;  %p234_p2 = scmp.eq.s32.totalorder %s1497_s13, 1 }
   0x7   : > { %p239_p3 = scmp.ne.s32.totalorder %s1414_s10, %s1410_s30  ;;  %p240_p4 = scmp.eq.s32.totalorder %s1304_s14, 1 }
   0x8   : > { %s1512_s18 = scalar_select %p221_p1, %s1418_s11, %s223_s16  }
   0x9   : > { %p1514_p5 = por %p234_p2, %p233_p0  ;;  %p1518_p6 = por %p240_p4, %p239_p3 }
   0xa   : > { %p1307_p7 = scmp.ge.s32.totalorder %s1422_s12, 1  ;;  %p291_p8 = scmp.lt.s32.totalorder %s1422_s12, 3 }
   0xc   : > { %p292_p9 = pnand %p1307_p7, %p291_p8 }
   0xd   : > { %s1309_s29 = sshll.u32 (!%p292_p9), %s1497_s13, 4  ;;  %s1316_s25 = sshll.u32 (!%p292_p9), %s1497_s13, 7 }
   0xe   : > { %295 = sbr.rel (%p292_p9) target bundleno = 707 (0x2c3), region = 56  ;;  %p328_p10 = scmp.lt.s32.totalorder (!%p292_p9), %s1309_s29, 31 }
   0xf   : > { %s1238_s14 = scalar_lea.hbm (!%p292_p9), %s2114_s9, %s1316_s25  ;;  %s1380_s25 = scalar_lea.hbm (!%p292_p9), %s2114_s9, 256 }
  0x10   : > { %s1241_s17 = sshll.u32 (!%p292_p9), %s1238_s14, 4  ;;  %s1242_s17 = int_to_ptr.hbm [resolvable:$true] %s1241_s17 }
  0x11   : > { %s1374_s13 = sshra.s32 (!%p292_p9), %s1242_s17, 4  ;;  %s1375_s13 = int_to_ptr.hbm [resolvable:$true] %s1374_s13 }
  0x12   : > { %s1376_s21 = scalar_lea.hbm (!%p292_p9), %s1375_s13, 128  ;;  %p1381_p0 = scmp.lt.s32.totalorder (!%p292_p9), %s1375_s13, %s2114_s9 }
  0x13   : > { %v380_v0 = vld [vmem:[%s2106_s1 + $0xf0] sm:$0xff]  ;;  %v378_v1 = vld [vmem:[%s2106_s1 + $0xe0] sm:$0xff]  ;;  %v381_v2 = vld [vmem:[%s2106_s1 + $0xf8] sm:$0xff]  ;;  %s2122_s29 = smov (!%p328_p10, %s1309_s29), 31  ;;  %p1377_p11 = scmp.ne.s32.totalorder %s1375_s13, %s1376_s21 }
  0x14   : > { %388 = vmatpush.msra.mxu0 %v380_v0  ;;  %453 = vmatpush.msra.mxu1 %v381_v2  ;;  %v379_v3 = vld [vmem:[%s2106_s1 + $0xe8] sm:$0xff]  ;;  %v376_v4 = vld [vmem:[%s2106_s1 + $0xd0] sm:$0xff]  ;;  %v377_v5 = vld [vmem:[%s2106_s1 + $0xd8] sm:$0xff]  ;;  %s1310_s27 = sshll.u32 %s2122_s29, 3  ;;  %p1382_p1 = scmp.lt.s32.totalorder %s1380_s25, %s1376_s21 }
  0x15   : > { %v374_v6 = vld [vmem:[%s2106_s1 + $0xc0] sm:$0xff]  ;;  %v375_v7 = vld [vmem:[%s2106_s1 + $0xc8] sm:$0xff]  ;;  %v372_v8 = vld [vmem:[%s2106_s1 + $0xb0] sm:$0xff]  ;;  %s1618_s26 = scalar_lea.vmem %s2105_s0, %s1310_s27  ;;  %p1378_p12 = pnand %p1377_p11, %p1514_p5 }
  0x16   : > { %389 = vmatpush.msra.mxu0 %v378_v1  ;;  %454 = vmatpush.msra.mxu1 %v379_v3  ;;  %v373_v9 = vld [vmem:[%s2106_s1 + $0xb8] sm:$0xff]  ;;  %v370_v10 = vld [vmem:[%s2106_s1 + $0xa0] sm:$0xff]  ;;  %v371_v11 = vld [vmem:[%s2106_s1 + $0xa8] sm:$0xff]  ;;  %p1383_p2 = por %p1382_p1, %p1381_p0 }
  0x17   : > { %v368_v12 = vld [vmem:[%s2106_s1 + $0x90] sm:$0xff]  ;;  %v369_v13 = vld [vmem:[%s2106_s1 + $0x98] sm:$0xff]  ;;  %v366_v14 = vld [vmem:[%s2106_s1 + $0x80] sm:$0xff]  ;;  %p1379_p13 = pneg %p1378_p12 }
  0x18   : > { %390 = vmatpush.msra.mxu0 %v376_v4  ;;  %455 = vmatpush.msra.mxu1 %v377_v5  ;;  %v367_v15 = vld [vmem:[%s2106_s1 + $0x88] sm:$0xff]  ;;  %v364_v16 = vld [vmem:[%s2106_s1 + $0x70] sm:$0xff]  ;;  %v365_v17 = vld [vmem:[%s2106_s1 + $0x78] sm:$0xff] }
  0x19   : > { %v362_v18 = vld [vmem:[%s2106_s1 + $0x60] sm:$0xff]  ;;  %v363_v19 = vld [vmem:[%s2106_s1 + $0x68] sm:$0xff]  ;;  %v360_v20 = vld [vmem:[%s2106_s1 + $0x50] sm:$0xff]  ;;  %p1384_p3 = pnand %p1383_p2, %p1379_p13 }
  0x1a   : > { %391 = vmatpush.msra.mxu0 %v374_v6  ;;  %456 = vmatpush.msra.mxu1 %v375_v7  ;;  %v361_v21 = vld [vmem:[%s2106_s1 + $0x58] sm:$0xff]  ;;  %v358_v22 = vld [vmem:[%s2106_s1 + $0x40] sm:$0xff]  ;;  %v359_v23 = vld [vmem:[%s2106_s1 + $0x48] sm:$0xff] }
  0x1b   : > { %v356_v24 = vld [vmem:[%s2106_s1 + $0x30] sm:$0xff]  ;;  %v357_v25 = vld [vmem:[%s2106_s1 + $0x38] sm:$0xff]  ;;  %v354_v26 = vld [vmem:[%s2106_s1 + $0x20] sm:$0xff] }
  0x1c   : > { %392 = vmatpush.msra.mxu0 %v372_v8  ;;  %457 = vmatpush.msra.mxu1 %v373_v9  ;;  %v355_v27 = vld [vmem:[%s2106_s1 + $0x28] sm:$0xff]  ;;  %v352_v28 = vld [vmem:[%s2106_s1 + $0x10] sm:$0xff]  ;;  %v353_v29 = vld [vmem:[%s2106_s1 + $0x18] sm:$0xff] }
  0x1d   : > { %v350_v30 = vld [vmem:[%s2106_s1] sm:$0xff]  ;;  %v351_v31 = vld [vmem:[%s2106_s1 + $0x8] sm:$0xff]  ;;  %v336_v34 = vld [vmem:[%s1618_s26 + $0x10] sm:$0xff] }
  0x1e   : > { %393 = vmatpush.msra.mxu0 %v370_v10  ;;  %458 = vmatpush.msra.mxu1 %v371_v11  ;;  %v334_v32 = vld [vmem:[%s1618_s26] sm:$0xff]  ;;  %v335_v33 = vld [vmem:[%s1618_s26 + $0x8] sm:$0xff]  ;;  %v337_v35 = vld [vmem:[%s1618_s26 + $0x18] sm:$0xff] }
  0x1f   : > { %v338_v36 = vld [vmem:[%s1618_s26 + $0x20] sm:$0xff]  ;;  %v339_v37 = vld [vmem:[%s1618_s26 + $0x28] sm:$0xff]  ;;  %v340_v38 = vld [vmem:[%s1618_s26 + $0x30] sm:$0xff] }
  0x20   : > { %394 = vmatpush.msra.mxu0 %v368_v12  ;;  %459 = vmatpush.msra.mxu1 %v369_v13  ;;  %v341_v39 = vld [vmem:[%s1618_s26 + $0x38] sm:$0xff]  ;;  %v342_v40 = vld [vmem:[%s1618_s26 + $0x40] sm:$0xff]  ;;  %v628_v42 = vld [vmem:[%s2108_s3 + $0x70] sm:$0xff] }
  0x21   : > { %v629_v41 = vld [vmem:[%s2108_s3 + $0x78] sm:$0xff]  ;;  %v644_v44 = vld [vmem:[%s2108_s3 + $0xf0] sm:$0xff]  ;;  %v627_v45 = vld [vmem:[%s2108_s3 + $0x68] sm:$0xff] }
  0x22   : > { %395 = vmatpush.msra.mxu0 %v366_v14  ;;  %460 = vmatpush.msra.mxu1 %v367_v15  ;;  %v645_v43 = vld [vmem:[%s2108_s3 + $0xf8] sm:$0xff]  ;;  %v343_v46 = vld [vmem:[%s1618_s26 + $0x48] sm:$0xff]  ;;  %v626_v47 = vld [vmem:[%s2108_s3 + $0x60] sm:$0xff] }
  0x23   : > { %650 = vmatpush.msra.mxu2 %v629_v41  ;;  %715 = vmatpush.msra.mxu3 %v645_v43  ;;  %v643_v48 = vld [vmem:[%s2108_s3 + $0xe8] sm:$0xff]  ;;  %v625_v49 = vld [vmem:[%s2108_s3 + $0x58] sm:$0xff]  ;;  %v642_v50 = vld [vmem:[%s2108_s3 + $0xe0] sm:$0xff] }
  0x24   : > { %396 = vmatpush.msra.mxu0 %v364_v16  ;;  %461 = vmatpush.msra.mxu1 %v365_v17  ;;  %v624_v51 = vld [vmem:[%s2108_s3 + $0x50] sm:$0xff]  ;;  %v641_v52 = vld [vmem:[%s2108_s3 + $0xd8] sm:$0xff]  ;;  %v623_v53 = vld [vmem:[%s2108_s3 + $0x48] sm:$0xff] }
  0x25   : > { %651 = vmatpush.msra.mxu2 %v628_v42  ;;  %716 = vmatpush.msra.mxu3 %v644_v44  ;;  %v640_v54 = vld [vmem:[%s2108_s3 + $0xd0] sm:$0xff]  ;;  %v622_v56 = vld [vmem:[%s2108_s3 + $0x40] sm:$0xff]  ;;  %v639_v57 = vld [vmem:[%s2108_s3 + $0xc8] sm:$0xff] }
  0x26   : > { %397 = vmatpush.msra.mxu0 %v362_v18  ;;  %462 = vmatpush.msra.mxu1 %v363_v19  ;;  %v344_v55 = vld [vmem:[%s1618_s26 + $0x50] sm:$0xff]  ;;  %v621_v58 = vld [vmem:[%s2108_s3 + $0x38] sm:$0xff]  ;;  %v638_v59 = vld [vmem:[%s2108_s3 + $0xc0] sm:$0xff] }
  0x27   : > { %652 = vmatpush.msra.mxu2 %v627_v45  ;;  %717 = vmatpush.msra.mxu3 %v643_v48  ;;  %v620_v60 = vld [vmem:[%s2108_s3 + $0x30] sm:$0xff]  ;;  %v637_v61 = vld [vmem:[%s2108_s3 + $0xb8] sm:$0xff]  ;;  %v619_v62 = vld [vmem:[%s2108_s3 + $0x28] sm:$0xff] }
  0x28   : > { %398 = vmatpush.msra.mxu0 %v360_v20  ;;  %463 = vmatpush.msra.mxu1 %v361_v21  ;;  %v636_v63 = vld [vmem:[%s2108_s3 + $0xb0] sm:$0xff]  ;;  %v345_v0 = vld [vmem:[%s1618_s26 + $0x58] sm:$0xff]  ;;  %v618_v1 = vld [vmem:[%s2108_s3 + $0x20] sm:$0xff] }
  0x29   : > { %653 = vmatpush.msra.mxu2 %v626_v47  ;;  %718 = vmatpush.msra.mxu3 %v642_v50  ;;  %v635_v2 = vld [vmem:[%s2108_s3 + $0xa8] sm:$0xff]  ;;  %v617_v3 = vld [vmem:[%s2108_s3 + $0x18] sm:$0xff]  ;;  %v634_v4 = vld [vmem:[%s2108_s3 + $0xa0] sm:$0xff] }
  0x2a   : > { %399 = vmatpush.msra.mxu0 %v358_v22  ;;  %464 = vmatpush.msra.mxu1 %v359_v23  ;;  %v616_v5 = vld [vmem:[%s2108_s3 + $0x10] sm:$0xff]  ;;  %v633_v6 = vld [vmem:[%s2108_s3 + $0x98] sm:$0xff]  ;;  %v346_v7 = vld [vmem:[%s1618_s26 + $0x60] sm:$0xff] }
  0x2b   : > { %654 = vmatpush.msra.mxu2 %v625_v49  ;;  %719 = vmatpush.msra.mxu3 %v641_v52  ;;  %v615_v8 = vld [vmem:[%s2108_s3 + $0x8] sm:$0xff]  ;;  %v632_v9 = vld [vmem:[%s2108_s3 + $0x90] sm:$0xff]  ;;  %v614_v10 = vld [vmem:[%s2108_s3] sm:$0xff] }
  0x2c   : > { %400 = vmatpush.msra.mxu0 %v356_v24  ;;  %465 = vmatpush.msra.mxu1 %v357_v25  ;;  %v631_v11 = vld [vmem:[%s2108_s3 + $0x88] sm:$0xff]  ;;  %v630_v12 = vld [vmem:[%s2108_s3 + $0x80] sm:$0xff]  ;;  %v810_v14 = vld [vmem:[%s2110_s5 + $0xf0] sm:$0xff] }
  0x2d   : > { %655 = vmatpush.msra.mxu2 %v624_v51  ;;  %720 = vmatpush.msra.mxu3 %v640_v54  ;;  %v347_v13 = vld [vmem:[%s1618_s26 + $0x68] sm:$0xff]  ;;  %v811_v15 = vld [vmem:[%s2110_s5 + $0xf8] sm:$0xff]  ;;  %v348_v16 = vld [vmem:[%s1618_s26 + $0x70] sm:$0xff] }
  0x2e   : > { %401 = vmatpush.msra.mxu0 %v354_v26  ;;  %466 = vmatpush.msra.mxu1 %v355_v27  ;;  %v808_v17 = vld [vmem:[%s2110_s5 + $0xe0] sm:$0xff]  ;;  %v809_v18 = vld [vmem:[%s2110_s5 + $0xe8] sm:$0xff]  ;;  %v349_v19 = vld [vmem:[%s1618_s26 + $0x78] sm:$0xff]  ;;  %s324_s26 = sand.u32 1, %s1414_s10  }
  0x2f   : > { %656 = vmatpush.msra.mxu2 %v623_v53  ;;  %721 = vmatpush.msra.mxu3 %v639_v57  ;;  %v382_v20 = vld [vmem:[%s2107_s2] sm:$0x3]  ;;  %v806_v23 = vld [vmem:[%s2110_s5 + $0xd0] sm:$0xff]  ;;  %v807_v24 = vld [vmem:[%s2110_s5 + $0xd8] sm:$0xff]  ;;  %s1308_s23 = sshll.u32 %s324_s26, 7  ;;  %s1227_s27 = scalar_lea.sflag [#allocation5], %s324_s26 }
  0x30   : > { %402 = vmatpush.msra.mxu0 %v352_v28  ;;  %467 = vmatpush.msra.mxu1 %v353_v29  ;;  %v1753_v21 = vperm.slane %v382_v20, 0  ;;  %v1755_v22 = vperm.slane %v382_v20, 1  ;;  %v800_v47 = vld [vmem:[%s2110_s5 + $0xa0] sm:$0xff]  ;;  %v801_v48 = vld [vmem:[%s2110_s5 + $0xa8] sm:$0xff]  ;;  %s2038_s24 = scalar_lea.vmem [#allocation4], %s1308_s23 }
  0x31   : > { %657 = vmatpush.msra.mxu2 %v622_v56  ;;  %722 = vmatpush.msra.mxu3 %v638_v59  ;;  %v799_v56 = vld [vmem:[%s2110_s5 + $0x98] sm:$0xff]  ;;  %s1239_s16 = sshll.u32 %s2038_s24, 4  ;;  %s1240_s16 = int_to_ptr.vmem [resolvable:$true] %s1239_s16 }
  0x32   : > { %403 = vmatpush.msra.mxu0 %v350_v30  ;;  %468 = vmatpush.msra.mxu1 %v351_v31  ;;  %v804_v31 = vld [vmem:[%s2110_s5 + $0xc0] sm:$0xff] }
  0x33   : > { %404 = vmatmul.f32.vlgmr.msra.gmra.mxu0 %v334_v32  ;;  %469 = vmatmul.f32.vlgmr.msra.gmra.mxu1 %v334_v32  ;;  %v805_v32 = vld [vmem:[%s2110_s5 + $0xc8] sm:$0xff] }
  0x34   : > { %658 = vmatpush.msra.mxu2 %v621_v58  ;;  %723 = vmatpush.msra.mxu3 %v637_v61 }
  0x35   : > { %818 = vmatpush.msrb.mxu0 %v810_v14  ;;  %883 = vmatpush.msrb.mxu1 %v811_v15  ;;  %v792_v15 = vld [vmem:[%s2110_s5 + $0x60] sm:$0xff] }
  0x36   : > { %659 = vmatpush.msra.mxu2 %v620_v60  ;;  %724 = vmatpush.msra.mxu3 %v636_v63  ;;  %v796_v63 = vld [vmem:[%s2110_s5 + $0x80] sm:$0xff] }
  0x37   : > { %819 = vmatpush.msrb.mxu0 %v808_v17  ;;  %884 = vmatpush.msrb.mxu1 %v809_v18 }
  0x38   : > { %660 = vmatpush.msra.mxu2 %v619_v62  ;;  %725 = vmatpush.msra.mxu3 %v635_v2 }
  0x39   : > { %820 = vmatpush.msrb.mxu0 %v806_v23  ;;  %885 = vmatpush.msrb.mxu1 %v807_v24 }
  0x3a   : > { %661 = vmatpush.msra.mxu2 %v618_v1  ;;  %726 = vmatpush.msra.mxu3 %v634_v4 }
  0x3b   : > { %407 = vmatmul.f32.gmra.mxu0 %v335_v33  ;;  %472 = vmatmul.f32.gmra.mxu1 %v335_v33 }
  0x3c   : > { %662 = vmatpush.msra.mxu2 %v617_v3  ;;  %727 = vmatpush.msra.mxu3 %v633_v6 }
  0x3d   : > { %821 = vmatpush.msrb.mxu0 %v804_v31  ;;  %886 = vmatpush.msrb.mxu1 %v805_v32 }
  0x3e   : > { %663 = vmatpush.msra.mxu2 %v616_v5  ;;  %728 = vmatpush.msra.mxu3 %v632_v9 }
  0x40   : > { %664 = vmatpush.msra.mxu2 %v615_v8  ;;  %729 = vmatpush.msra.mxu3 %v631_v11  ;;  %v795_v8 = vld [vmem:[%s2110_s5 + $0x78] sm:$0xff] }
  0x42   : > { %665 = vmatpush.msra.mxu2 %v614_v10  ;;  %730 = vmatpush.msra.mxu3 %v630_v12 }
  0x43   : > { %410 = vmatmul.f32.gmra.mxu0 %v336_v34  ;;  %475 = vmatmul.f32.gmra.mxu1 %v336_v34 }
  0x4b   : > { %413 = vmatmul.f32.gmra.mxu0 %v337_v35  ;;  %478 = vmatmul.f32.gmra.mxu1 %v337_v35 }
  0x53   : > { %416 = vmatmul.f32.gmra.mxu0 %v338_v36  ;;  %481 = vmatmul.f32.gmra.mxu1 %v338_v36 }
  0x5b   : > { %419 = vmatmul.f32.gmra.mxu0 %v339_v37  ;;  %484 = vmatmul.f32.gmra.mxu1 %v339_v37 }
  0x63   : > { %422 = vmatmul.f32.gmra.mxu0 %v340_v38  ;;  %487 = vmatmul.f32.gmra.mxu1 %v340_v38 }
  0x6b   : > { %425 = vmatmul.f32.gmra.mxu0 %v341_v39  ;;  %490 = vmatmul.f32.gmra.mxu1 %v341_v39  ;;  %v802_v39 = vld [vmem:[%s2110_s5 + $0xb0] sm:$0xff] }
  0x6c   : > { %822 = vmatpush.msrb.mxu0 %v802_v39 }
  0x6e   : > { %823 = vmatpush.msrb.mxu0 %v800_v47 }
  0x73   : > { %428 = vmatmul.f32.gmra.mxu0 %v342_v40  ;;  %493 = vmatmul.f32.gmra.mxu1 %v342_v40  ;;  %v803_v40 = vld [vmem:[%s2110_s5 + $0xb8] sm:$0xff] }
  0x74   : > { %887 = vmatpush.msrb.mxu1 %v803_v40 }
  0x76   : > { %888 = vmatpush.msrb.mxu1 %v801_v48 }
  0x78   : > { %889 = vmatpush.msrb.mxu1 %v799_v56 }
  0x7b   : > { %431 = vmatmul.f32.gmra.mxu0 %v343_v46  ;;  %496 = vmatmul.f32.gmra.mxu1 %v343_v46 }
  0x83   : > { %434 = vmatmul.f32.gmra.mxu0 %v344_v55  ;;  %499 = vmatmul.f32.gmra.mxu1 %v344_v55  ;;  %v798_v55 = vld [vmem:[%s2110_s5 + $0x90] sm:$0xff] }
  0x84   : > { %824 = vmatpush.msrb.mxu0 %v798_v55 }
  0x86   : > { %825 = vmatpush.msrb.mxu0 %v796_v63 }
  0x8b   : > { %437 = vmatmul.f32.gmra.mxu0 %v345_v0  ;;  %502 = vmatmul.f32.gmra.mxu1 %v345_v0  ;;  %v797_v0 = vld [vmem:[%s2110_s5 + $0x88] sm:$0xff] }
  0x8c   : > { %890 = vmatpush.msrb.mxu1 %v797_v0 }
  0x8e   : > { %891 = vmatpush.msrb.mxu1 %v795_v8 }
  0x93   : > { %440 = vmatmul.f32.gmra.mxu0 %v346_v7  ;;  %505 = vmatmul.f32.gmra.mxu1 %v346_v7  ;;  %v794_v7 = vld [vmem:[%s2110_s5 + $0x70] sm:$0xff] }
  0x94   : > { %826 = vmatpush.msrb.mxu0 %v794_v7 }
  0x96   : > { %827 = vmatpush.msrb.mxu0 %v792_v15 }
  0x9b   : > { %443 = vmatmul.f32.gmra.mxu0 %v347_v13  ;;  %508 = vmatmul.f32.gmra.mxu1 %v347_v13 }
  0xa3   : > { %446 = vmatmul.f32.gmra.mxu0 %v348_v16  ;;  %511 = vmatmul.f32.gmra.mxu1 %v348_v16  ;;  %v793_v16 = vld [vmem:[%s2110_s5 + $0x68] sm:$0xff] }
  0xa4   : > { %892 = vmatpush.msrb.mxu1 %v793_v16 }
  0xab   : > { %449 = vmatmul.f32.gmra.mxu0 %v349_v19  ;;  %514 = vmatmul.f32.gmra.mxu1 %v349_v19 }
  0xb0   : > { %v405_v25 = vpop.f32.mrf.mxu0  ;;  %v470_v26 = vpop.f32.mrf.mxu1 }
  0xb1   : > { %v406_v27 = vadd.f32 %v405_v25, %v1753_v21  ;;  %v471_v28 = vadd.f32 %v470_v26, %v1755_v22  ;;  %v790_v25 = vld [vmem:[%s2110_s5 + $0x50] sm:$0xff]  ;;  %v791_v26 = vld [vmem:[%s2110_s5 + $0x58] sm:$0xff] }
  0xb2   : > { %828 = vmatpush.msrb.mxu0 %v790_v25  ;;  %893 = vmatpush.msrb.mxu1 %v791_v26 }
  0xb3   : > { %v518_v29 = vmax.f32 %v406_v27, 0.0  ;;  %v519_v30 = vmax.f32 %v471_v28, 0.0 }
  0xb5   : > { %666 = vmatmul.f32.vlgmr.msra.gmra.mxu2 %v518_v29  ;;  %731 = vmatmul.f32.vlgmr.msra.gmra.mxu3 %v519_v30 }
  0xb8   : > { %v408_v33 = vpop.f32.mrf.mxu0  ;;  %v473_v34 = vpop.f32.mrf.mxu1 }
  0xb9   : > { %v409_v35 = vadd.f32 %v408_v33, %v1753_v21  ;;  %v474_v36 = vadd.f32 %v473_v34, %v1755_v22  ;;  %v788_v33 = vld [vmem:[%s2110_s5 + $0x40] sm:$0xff]  ;;  %v789_v34 = vld [vmem:[%s2110_s5 + $0x48] sm:$0xff] }
  0xba   : > { %829 = vmatpush.msrb.mxu0 %v788_v33  ;;  %894 = vmatpush.msrb.mxu1 %v789_v34  ;;  %v1055_v34 = vld [vmem:[%s2112_s7 + $0x58] sm:$0xff] }
  0xbb   : > { %v520_v37 = vmax.f32 %v409_v35, 0.0  ;;  %v521_v38 = vmax.f32 %v474_v36, 0.0 }
  0xbd   : > { %669 = vmatmul.f32.gmra.mxu2 %v520_v37  ;;  %734 = vmatmul.f32.gmra.mxu3 %v521_v38 }
  0xc0   : > { %v411_v41 = vpop.f32.mrf.mxu0  ;;  %v476_v42 = vpop.f32.mrf.mxu1 }
  0xc1   : > { %v412_v43 = vadd.f32 %v411_v41, %v1753_v21  ;;  %v477_v44 = vadd.f32 %v476_v42, %v1755_v22  ;;  %v786_v41 = vld [vmem:[%s2110_s5 + $0x30] sm:$0xff]  ;;  %v787_v42 = vld [vmem:[%s2110_s5 + $0x38] sm:$0xff] }
  0xc2   : > { %830 = vmatpush.msrb.mxu0 %v786_v41  ;;  %895 = vmatpush.msrb.mxu1 %v787_v42 }
  0xc3   : > { %v522_v45 = vmax.f32 %v412_v43, 0.0  ;;  %v523_v46 = vmax.f32 %v477_v44, 0.0 }
  0xc5   : > { %672 = vmatmul.f32.gmra.mxu2 %v522_v45  ;;  %737 = vmatmul.f32.gmra.mxu3 %v523_v46 }
  0xc8   : > { %v414_v49 = vpop.f32.mrf.mxu0  ;;  %v479_v50 = vpop.f32.mrf.mxu1 }
  0xc9   : > { %v415_v51 = vadd.f32 %v414_v49, %v1753_v21  ;;  %v480_v52 = vadd.f32 %v479_v50, %v1755_v22  ;;  %v784_v49 = vld [vmem:[%s2110_s5 + $0x20] sm:$0xff]  ;;  %v785_v50 = vld [vmem:[%s2110_s5 + $0x28] sm:$0xff] }
  0xca   : > { %831 = vmatpush.msrb.mxu0 %v784_v49  ;;  %896 = vmatpush.msrb.mxu1 %v785_v50  ;;  %v1069_v50 = vld [vmem:[%s2112_s7 + $0xc8] sm:$0xff] }
  0xcb   : > { %v524_v53 = vmax.f32 %v415_v51, 0.0  ;;  %v525_v54 = vmax.f32 %v480_v52, 0.0 }
  0xcd   : > { %675 = vmatmul.f32.gmra.mxu2 %v524_v53  ;;  %740 = vmatmul.f32.gmra.mxu3 %v525_v54 }
  0xd0   : > { %v417_v57 = vpop.f32.mrf.mxu0  ;;  %v482_v58 = vpop.f32.mrf.mxu1 }
  0xd1   : > { %v418_v59 = vadd.f32 %v417_v57, %v1753_v21  ;;  %v483_v60 = vadd.f32 %v482_v58, %v1755_v22  ;;  %v782_v57 = vld [vmem:[%s2110_s5 + $0x10] sm:$0xff]  ;;  %v783_v58 = vld [vmem:[%s2110_s5 + $0x18] sm:$0xff] }
  0xd2   : > { %832 = vmatpush.msrb.mxu0 %v782_v57  ;;  %897 = vmatpush.msrb.mxu1 %v783_v58  ;;  %v1051_v58 = vld [vmem:[%s2112_s7 + $0x38] sm:$0xff] }
  0xd3   : > { %v526_v61 = vmax.f32 %v418_v59, 0.0  ;;  %v527_v62 = vmax.f32 %v483_v60, 0.0  ;;  %v780_v59 = vld [vmem:[%s2110_s5] sm:$0xff]  ;;  %v781_v60 = vld [vmem:[%s2110_s5 + $0x8] sm:$0xff] }
  0xd4   : > { %833 = vmatpush.msrb.mxu0 %v780_v59  ;;  %898 = vmatpush.msrb.mxu1 %v781_v60 }
  0xd5   : > { %678 = vmatmul.f32.gmra.mxu2 %v526_v61  ;;  %743 = vmatmul.f32.gmra.mxu3 %v527_v62 }
  0xd8   : > { %v420_v1 = vpop.f32.mrf.mxu0  ;;  %v485_v2 = vpop.f32.mrf.mxu1 }
  0xd9   : > { %v421_v3 = vadd.f32 %v420_v1, %v1753_v21  ;;  %v486_v4 = vadd.f32 %v485_v2, %v1755_v22 }
  0xdb   : > { %v528_v5 = vmax.f32 %v421_v3, 0.0  ;;  %v529_v6 = vmax.f32 %v486_v4, 0.0 }
  0xdd   : > { %681 = vmatmul.f32.gmra.mxu2 %v528_v5  ;;  %746 = vmatmul.f32.gmra.mxu3 %v529_v6 }
  0xe0   : > { %v423_v9 = vpop.f32.mrf.mxu0  ;;  %v488_v10 = vpop.f32.mrf.mxu1 }
  0xe1   : > { %v424_v11 = vadd.f32 %v423_v9, %v1753_v21  ;;  %v489_v12 = vadd.f32 %v488_v10, %v1755_v22  ;;  %v1059_v9 = vld [vmem:[%s2112_s7 + $0x78] sm:$0xff] }
  0xe2   : > { %1080 = vmatpush.msrb.mxu2 %v1059_v9 }
  0xe3   : > { %v530_v13 = vmax.f32 %v424_v11, 0.0  ;;  %v531_v14 = vmax.f32 %v489_v12, 0.0 }
  0xe5   : > { %684 = vmatmul.f32.gmra.mxu2 %v530_v13  ;;  %749 = vmatmul.f32.gmra.mxu3 %v531_v14  ;;  %v1075_v14 = vld [vmem:[%s2112_s7 + $0xf8] sm:$0xff] }
  0xe6   : > { %1145 = vmatpush.msrb.mxu3 %v1075_v14 }
  0xe8   : > { %v426_v17 = vpop.f32.mrf.mxu0  ;;  %v491_v18 = vpop.f32.mrf.mxu1 }
  0xe9   : > { %v427_v19 = vadd.f32 %v426_v17, %v1753_v21  ;;  %v492_v20 = vadd.f32 %v491_v18, %v1755_v22  ;;  %v1058_v17 = vld [vmem:[%s2112_s7 + $0x70] sm:$0xff] }
  0xea   : > { %1081 = vmatpush.msrb.mxu2 %v1058_v17 }
  0xeb   : > { %v532_v23 = vmax.f32 %v427_v19, 0.0  ;;  %v533_v24 = vmax.f32 %v492_v20, 0.0 }
  0xed   : > { %687 = vmatmul.f32.gmra.mxu2 %v532_v23  ;;  %752 = vmatmul.f32.gmra.mxu3 %v533_v24  ;;  %v1074_v24 = vld [vmem:[%s2112_s7 + $0xf0] sm:$0xff] }
  0xee   : > { %1146 = vmatpush.msrb.mxu3 %v1074_v24  ;;  %v1063_v24 = vld [vmem:[%s2112_s7 + $0x98] sm:$0xff] }
  0xf0   : > { %v429_v27 = vpop.f32.mrf.mxu0  ;;  %v494_v28 = vpop.f32.mrf.mxu1 }
  0xf1   : > { %v430_v29 = vadd.f32 %v429_v27, %v1753_v21  ;;  %v495_v30 = vadd.f32 %v494_v28, %v1755_v22  ;;  %v1057_v27 = vld [vmem:[%s2112_s7 + $0x68] sm:$0xff]  ;;  %v1056_v28 = vld [vmem:[%s2112_s7 + $0x60] sm:$0xff] }
  0xf2   : > { %1082 = vmatpush.msrb.mxu2 %v1057_v27 }
  0xf3   : > { %v534_v31 = vmax.f32 %v430_v29, 0.0  ;;  %v535_v32 = vmax.f32 %v495_v30, 0.0 }
  0xf4   : > { %1083 = vmatpush.msrb.mxu2 %v1056_v28 }
  0xf5   : > { %690 = vmatmul.f32.gmra.mxu2 %v534_v31  ;;  %755 = vmatmul.f32.gmra.mxu3 %v535_v32  ;;  %v1072_v32 = vld [vmem:[%s2112_s7 + $0xe0] sm:$0xff] }
  0xf6   : > { %1084 = vmatpush.msrb.mxu2 %v1055_v34 }
  0xf8   : > { %v432_v35 = vpop.f32.mrf.mxu0  ;;  %v497_v36 = vpop.f32.mrf.mxu1 }
  0xf9   : > { %v433_v37 = vadd.f32 %v432_v35, %v1753_v21  ;;  %v498_v38 = vadd.f32 %v497_v36, %v1755_v22 }
  0xfb   : > { %v536_v39 = vmax.f32 %v433_v37, 0.0  ;;  %v537_v40 = vmax.f32 %v498_v38, 0.0  ;;  %v1071_v38 = vld [vmem:[%s2112_s7 + $0xd8] sm:$0xff] }
  0xfd   : > { %693 = vmatmul.f32.gmra.mxu2 %v536_v39  ;;  %758 = vmatmul.f32.gmra.mxu3 %v537_v40  ;;  %v1054_v40 = vld [vmem:[%s2112_s7 + $0x50] sm:$0xff] }
  0xfe   : > { %1085 = vmatpush.msrb.mxu2 %v1054_v40 }
 0x100   : > { %v435_v43 = vpop.f32.mrf.mxu0  ;;  %v500_v44 = vpop.f32.mrf.mxu1 }
 0x101   : > { %v436_v45 = vadd.f32 %v435_v43, %v1753_v21  ;;  %v501_v46 = vadd.f32 %v500_v44, %v1755_v22  ;;  %v1070_v44 = vld [vmem:[%s2112_s7 + $0xd0] sm:$0xff] }
 0x103   : > { %v538_v47 = vmax.f32 %v436_v45, 0.0  ;;  %v539_v48 = vmax.f32 %v501_v46, 0.0  ;;  %v1053_v46 = vld [vmem:[%s2112_s7 + $0x48] sm:$0xff] }
 0x104   : > { %1086 = vmatpush.msrb.mxu2 %v1053_v46 }
 0x105   : > { %696 = vmatmul.f32.gmra.mxu2 %v538_v47  ;;  %761 = vmatmul.f32.gmra.mxu3 %v539_v48 }
 0x108   : > { %v438_v51 = vpop.f32.mrf.mxu0  ;;  %v503_v52 = vpop.f32.mrf.mxu1 }
 0x109   : > { %v439_v53 = vadd.f32 %v438_v51, %v1753_v21  ;;  %v504_v54 = vadd.f32 %v503_v52, %v1755_v22  ;;  %v1052_v52 = vld [vmem:[%s2112_s7 + $0x40] sm:$0xff] }
 0x10a   : > { %1087 = vmatpush.msrb.mxu2 %v1052_v52 }
 0x10b   : > { %v540_v55 = vmax.f32 %v439_v53, 0.0  ;;  %v541_v56 = vmax.f32 %v504_v54, 0.0 }
 0x10c   : > { %1088 = vmatpush.msrb.mxu2 %v1051_v58 }
 0x10d   : > { %699 = vmatmul.f32.gmra.mxu2 %v540_v55  ;;  %764 = vmatmul.f32.gmra.mxu3 %v541_v56  ;;  %v1068_v56 = vld [vmem:[%s2112_s7 + $0xc0] sm:$0xff] }
 0x110   : > { %v441_v61 = vpop.f32.mrf.mxu0  ;;  %v506_v62 = vpop.f32.mrf.mxu1 }
 0x111   : > { %v442_v63 = vadd.f32 %v441_v61, %v1753_v21  ;;  %v507_v0 = vadd.f32 %v506_v62, %v1755_v22  ;;  %v1067_v62 = vld [vmem:[%s2112_s7 + $0xb8] sm:$0xff] }
 0x113   : > { %v542_v1 = vmax.f32 %v442_v63, 0.0  ;;  %v543_v2 = vmax.f32 %v507_v0, 0.0  ;;  %v1050_v0 = vld [vmem:[%s2112_s7 + $0x30] sm:$0xff] }
 0x114   : > { %1089 = vmatpush.msrb.mxu2 %v1050_v0 }
 0x115   : > { %702 = vmatmul.f32.gmra.mxu2 %v542_v1  ;;  %767 = vmatmul.f32.gmra.mxu3 %v543_v2 }
 0x118   : > { %v444_v3 = vpop.f32.mrf.mxu0  ;;  %v509_v4 = vpop.f32.mrf.mxu1 }
 0x119   : > { %v445_v5 = vadd.f32 %v444_v3, %v1753_v21  ;;  %v510_v6 = vadd.f32 %v509_v4, %v1755_v22  ;;  %v1066_v4 = vld [vmem:[%s2112_s7 + $0xb0] sm:$0xff] }
 0x11b   : > { %v544_v7 = vmax.f32 %v445_v5, 0.0  ;;  %v545_v8 = vmax.f32 %v510_v6, 0.0  ;;  %v1049_v6 = vld [vmem:[%s2112_s7 + $0x28] sm:$0xff] }
 0x11c   : > { %1090 = vmatpush.msrb.mxu2 %v1049_v6 }
 0x11d   : > { %705 = vmatmul.f32.gmra.mxu2 %v544_v7  ;;  %770 = vmatmul.f32.gmra.mxu3 %v545_v8 }
 0x120   : > { %v447_v10 = vpop.f32.mrf.mxu0  ;;  %v512_v11 = vpop.f32.mrf.mxu1 }
 0x121   : > { %v448_v12 = vadd.f32 %v447_v10, %v1753_v21  ;;  %v513_v13 = vadd.f32 %v512_v11, %v1755_v22  ;;  %v1065_v10 = vld [vmem:[%s2112_s7 + $0xa8] sm:$0xff] }
 0x123   : > { %v546_v15 = vmax.f32 %v448_v12, 0.0  ;;  %v547_v16 = vmax.f32 %v513_v13, 0.0  ;;  %v1048_v12 = vld [vmem:[%s2112_s7 + $0x20] sm:$0xff] }
 0x124   : > { %1091 = vmatpush.msrb.mxu2 %v1048_v12 }
 0x125   : > { %708 = vmatmul.f32.gmra.mxu2 %v546_v15  ;;  %773 = vmatmul.f32.gmra.mxu3 %v547_v16  ;;  %v1064_v16 = vld [vmem:[%s2112_s7 + $0xa0] sm:$0xff] }
 0x128   : > { %v450_v18 = vpop.f32.mrf.mxu0  ;;  %v515_v19 = vpop.f32.mrf.mxu1 }
 0x129   : > { %v451_v20 = vadd.f32 %v450_v18, %v1753_v21  ;;  %v516_v23 = vadd.f32 %v515_v19, %v1755_v22  ;;  %v1073_v21 = vld [vmem:[%s2112_s7 + $0xe8] sm:$0xff]  ;;  %v1894_v22 = vld [vmem:[%s2109_s4] ss:$0 sm:$0xff]  ;;  %v1047_v18 = vld [vmem:[%s2112_s7 + $0x18] sm:$0xff] }
 0x12a   : > { %1147 = vmatpush.msrb.mxu3 %v1073_v21  ;;  %1092 = vmatpush.msrb.mxu2 %v1047_v18 }
 0x12b   : > { %v548_v25 = vmax.f32 %v451_v20, 0.0  ;;  %v549_v26 = vmax.f32 %v516_v23, 0.0 }
 0x12c   : > { %1148 = vmatpush.msrb.mxu3 %v1072_v32 }
 0x12d   : > { %711 = vmatmul.f32.gmra.mxu2 %v548_v25  ;;  %776 = vmatmul.f32.gmra.mxu3 %v549_v26  ;;  %v1046_v26 = vld [vmem:[%s2112_s7 + $0x10] sm:$0xff] }
 0x12e   : > { %1149 = vmatpush.msrb.mxu3 %v1071_v38  ;;  %1093 = vmatpush.msrb.mxu2 %v1046_v26  ;;  %v1060_v38 = vld [vmem:[%s2112_s7 + $0x80] sm:$0xff] }
 0x130   : > { %1150 = vmatpush.msrb.mxu3 %v1070_v44 }
 0x132   : > { %1151 = vmatpush.msrb.mxu3 %v1069_v50 }
 0x134   : > { %1152 = vmatpush.msrb.mxu3 %v1068_v56 }
 0x136   : > { %1153 = vmatpush.msrb.mxu3 %v1067_v62 }
 0x138   : > { %v667_v29 = vpop.f32.mrf.mxu2  ;;  %v732_v30 = vpop.f32.mrf.mxu3  ;;  %1154 = vmatpush.msrb.mxu3 %v1066_v4 }
 0x139   : > { %v668_v31 = vadd.f32 %v1894_v22, %v667_v29  ;;  %v1062_v29 = vld [vmem:[%s2112_s7 + $0x90] sm:$0xff] }
 0x13a   : > { %1155 = vmatpush.msrb.mxu3 %v1065_v10 }
 0x13b   : > { %v733_v33 = vadd.f32 %v732_v30, %v668_v31  ;;  %v1045_v31 = vld [vmem:[%s2112_s7 + $0x8] sm:$0xff] }
 0x13c   : > { %1156 = vmatpush.msrb.mxu3 %v1064_v16  ;;  %1094 = vmatpush.msrb.mxu2 %v1045_v31 }
 0x13d   : > { %834 = vmatmul.f32.vlgmr.msrb.gmra.mxu0 %v733_v33  ;;  %899 = vmatmul.f32.vlgmr.msrb.gmra.mxu1 %v733_v33 }
 0x13e   : > { %1157 = vmatpush.msrb.mxu3 %v1063_v24 }
 0x140   : > { %v670_v35 = vpop.f32.mrf.mxu2  ;;  %v735_v36 = vpop.f32.mrf.mxu3  ;;  %1158 = vmatpush.msrb.mxu3 %v1062_v29 }
 0x141   : > { %v671_v37 = vadd.f32 %v1894_v22, %v670_v35  ;;  %v1061_v35 = vld [vmem:[%s2112_s7 + $0x88] sm:$0xff] }
 0x142   : > { %1159 = vmatpush.msrb.mxu3 %v1061_v35 }
 0x143   : > { %v736_v39 = vadd.f32 %v735_v36, %v671_v37  ;;  %v1044_v37 = vld [vmem:[%s2112_s7] sm:$0xff] }
 0x144   : > { %1095 = vmatpush.msrb.mxu2 %v1044_v37  ;;  %1160 = vmatpush.msrb.mxu3 %v1060_v38 }
 0x145   : > { %837 = vmatmul.f32.gmra.mxu0 %v736_v39  ;;  %902 = vmatmul.f32.gmra.mxu1 %v736_v39 }
 0x148   : > { %v673_v41 = vpop.f32.mrf.mxu2  ;;  %v738_v42 = vpop.f32.mrf.mxu3 }
 0x149   : > { %v674_v43 = vadd.f32 %v1894_v22, %v673_v41 }
 0x14b   : > { %v739_v45 = vadd.f32 %v738_v42, %v674_v43 }
 0x14d   : > { %840 = vmatmul.f32.gmra.mxu0 %v739_v45  ;;  %905 = vmatmul.f32.gmra.mxu1 %v739_v45 }
 0x150   : > { %v676_v47 = vpop.f32.mrf.mxu2  ;;  %v741_v48 = vpop.f32.mrf.mxu3 }
 0x151   : > { %v677_v49 = vadd.f32 %v1894_v22, %v676_v47 }
 0x153   : > { %v742_v51 = vadd.f32 %v741_v48, %v677_v49 }
 0x155   : > { %843 = vmatmul.f32.gmra.mxu0 %v742_v51  ;;  %908 = vmatmul.f32.gmra.mxu1 %v742_v51 }
 0x158   : > { %v679_v53 = vpop.f32.mrf.mxu2  ;;  %v744_v54 = vpop.f32.mrf.mxu3 }
 0x159   : > { %v680_v55 = vadd.f32 %v1894_v22, %v679_v53 }
 0x15b   : > { %v745_v57 = vadd.f32 %v744_v54, %v680_v55  ;;  %v812_v55 = vld [vmem:[%s2111_s6] sm:$0x3] }
 0x15c   : > { %v1993_v56 = vperm.slane %v812_v55, 0 }
 0x15d   : > { %846 = vmatmul.f32.gmra.mxu0 %v745_v57  ;;  %911 = vmatmul.f32.gmra.mxu1 %v745_v57  ;;  %v1995_v57 = vperm.slane %v812_v55, 1 }
 0x160   : > { %v682_v59 = vpop.f32.mrf.mxu2  ;;  %v747_v60 = vpop.f32.mrf.mxu3 }
 0x161   : > { %v683_v61 = vadd.f32 %v1894_v22, %v682_v59 }
 0x163   : > { %v748_v63 = vadd.f32 %v747_v60, %v683_v61 }
 0x165   : > { %849 = vmatmul.f32.gmra.mxu0 %v748_v63  ;;  %914 = vmatmul.f32.gmra.mxu1 %v748_v63 }
 0x168   : > { %v685_v1 = vpop.f32.mrf.mxu2  ;;  %v750_v2 = vpop.f32.mrf.mxu3 }
 0x169   : > { %v686_v3 = vadd.f32 %v1894_v22, %v685_v1 }
 0x16b   : > { %v751_v5 = vadd.f32 %v750_v2, %v686_v3 }
 0x16d   : > { %852 = vmatmul.f32.gmra.mxu0 %v751_v5  ;;  %917 = vmatmul.f32.gmra.mxu1 %v751_v5 }
 0x170   : > { %v688_v7 = vpop.f32.mrf.mxu2  ;;  %v753_v8 = vpop.f32.mrf.mxu3 }
 0x171   : > { %v689_v9 = vadd.f32 %v1894_v22, %v688_v7 }
 0x173   : > { %v754_v11 = vadd.f32 %v753_v8, %v689_v9 }
 0x175   : > { %855 = vmatmul.f32.gmra.mxu0 %v754_v11  ;;  %920 = vmatmul.f32.gmra.mxu1 %v754_v11 }
 0x178   : > { %v691_v13 = vpop.f32.mrf.mxu2  ;;  %v756_v14 = vpop.f32.mrf.mxu3 }
 0x179   : > { %v692_v15 = vadd.f32 %v1894_v22, %v691_v13 }
 0x17b   : > { %v757_v17 = vadd.f32 %v756_v14, %v692_v15 }
 0x17d   : > { %858 = vmatmul.f32.gmra.mxu0 %v757_v17  ;;  %923 = vmatmul.f32.gmra.mxu1 %v757_v17 }
 0x180   : > { %v694_v19 = vpop.f32.mrf.mxu2  ;;  %v759_v20 = vpop.f32.mrf.mxu3 }
 0x181   : > { %v695_v23 = vadd.f32 %v1894_v22, %v694_v19 }
 0x183   : > { %v760_v25 = vadd.f32 %v759_v20, %v695_v23 }
 0x185   : > { %861 = vmatmul.f32.gmra.mxu0 %v760_v25  ;;  %926 = vmatmul.f32.gmra.mxu1 %v760_v25 }
 0x188   : > { %v697_v27 = vpop.f32.mrf.mxu2  ;;  %v762_v21 = vpop.f32.mrf.mxu3 }
 0x189   : > { %v698_v28 = vadd.f32 %v1894_v22, %v697_v27 }
 0x18b   : > { %v763_v30 = vadd.f32 %v762_v21, %v698_v28 }
 0x18d   : > { %864 = vmatmul.f32.gmra.mxu0 %v763_v30  ;;  %929 = vmatmul.f32.gmra.mxu1 %v763_v30 }
 0x190   : > { %v700_v32 = vpop.f32.mrf.mxu2  ;;  %v765_v33 = vpop.f32.mrf.mxu3 }
 0x191   : > { %v701_v34 = vadd.f32 %v1894_v22, %v700_v32 }
 0x193   : > { %v766_v36 = vadd.f32 %v765_v33, %v701_v34 }
 0x195   : > { %867 = vmatmul.f32.gmra.mxu0 %v766_v36  ;;  %932 = vmatmul.f32.gmra.mxu1 %v766_v36 }
 0x198   : > { %v703_v39 = vpop.f32.mrf.mxu2  ;;  %v768_v40 = vpop.f32.mrf.mxu3 }
 0x199   : > { %v704_v41 = vadd.f32 %v1894_v22, %v703_v39 }
 0x19b   : > { %v769_v42 = vadd.f32 %v768_v40, %v704_v41 }
 0x19d   : > { %870 = vmatmul.f32.gmra.mxu0 %v769_v42  ;;  %935 = vmatmul.f32.gmra.mxu1 %v769_v42 }
 0x1a0   : > { %v706_v43 = vpop.f32.mrf.mxu2  ;;  %v771_v44 = vpop.f32.mrf.mxu3 }
 0x1a1   : > { %v707_v45 = vadd.f32 %v1894_v22, %v706_v43 }
 0x1a3   : > { %v772_v46 = vadd.f32 %v771_v44, %v707_v45 }
 0x1a5   : > { %873 = vmatmul.f32.gmra.mxu0 %v772_v46  ;;  %938 = vmatmul.f32.gmra.mxu1 %v772_v46 }
 0x1a8   : > { %v709_v47 = vpop.f32.mrf.mxu2  ;;  %v774_v48 = vpop.f32.mrf.mxu3 }
 0x1a9   : > { %v710_v49 = vadd.f32 %v1894_v22, %v709_v47 }
 0x1ab   : > { %v775_v50 = vadd.f32 %v774_v48, %v710_v49 }
 0x1ad   : > { %876 = vmatmul.f32.gmra.mxu0 %v775_v50  ;;  %941 = vmatmul.f32.gmra.mxu1 %v775_v50 }
 0x1b0   : > { %v712_v51 = vpop.f32.mrf.mxu2  ;;  %v777_v52 = vpop.f32.mrf.mxu3 }
 0x1b1   : > { %v713_v53 = vadd.f32 %v1894_v22, %v712_v51 }
 0x1b3   : > { %v778_v54 = vadd.f32 %v777_v52, %v713_v53 }
 0x1b5   : > { %879 = vmatmul.f32.gmra.mxu0 %v778_v54  ;;  %944 = vmatmul.f32.gmra.mxu1 %v778_v54 }
 0x1ba   : > { %v835_v58 = vpop.f32.mrf.mxu0  ;;  %v900_v59 = vpop.f32.mrf.mxu1 }
 0x1bb   : > { %v836_v60 = vadd.f32 %v835_v58, %v1993_v56  ;;  %v901_v61 = vadd.f32 %v900_v59, %v1995_v57 }
 0x1bd   : > { %v948_v62 = vmax.f32 %v836_v60, 0.0  ;;  %v949_v63 = vmax.f32 %v901_v61, 0.0 }
 0x1bf   : > { %1096 = vmatmul.f32.vlgmr.msrb.gmra.mxu2 %v948_v62  ;;  %1161 = vmatmul.f32.vlgmr.msrb.gmra.mxu3 %v949_v63 }
 0x1c2   : > { %v838_v22 = vpop.f32.mrf.mxu0  ;;  %v903_v0 = vpop.f32.mrf.mxu1 }
 0x1c3   : > { %v839_v1 = vadd.f32 %v838_v22, %v1993_v56  ;;  %v904_v2 = vadd.f32 %v903_v0, %v1995_v57 }
 0x1c5   : > { %v950_v3 = vmax.f32 %v839_v1, 0.0  ;;  %v951_v4 = vmax.f32 %v904_v2, 0.0 }
 0x1c7   : > { %1099 = vmatmul.f32.gmra.mxu2 %v950_v3  ;;  %1164 = vmatmul.f32.gmra.mxu3 %v951_v4 }
 0x1ca   : > { %v841_v5 = vpop.f32.mrf.mxu0  ;;  %v906_v6 = vpop.f32.mrf.mxu1 }
 0x1cb   : > { %v842_v7 = vadd.f32 %v841_v5, %v1993_v56  ;;  %v907_v8 = vadd.f32 %v906_v6, %v1995_v57 }
 0x1cd   : > { %v952_v9 = vmax.f32 %v842_v7, 0.0  ;;  %v953_v10 = vmax.f32 %v907_v8, 0.0 }
 0x1cf   : > { %1102 = vmatmul.f32.gmra.mxu2 %v952_v9  ;;  %1167 = vmatmul.f32.gmra.mxu3 %v953_v10 }
 0x1d2   : > { %v844_v11 = vpop.f32.mrf.mxu0  ;;  %v909_v12 = vpop.f32.mrf.mxu1 }
 0x1d3   : > { %v845_v13 = vadd.f32 %v844_v11, %v1993_v56  ;;  %v910_v14 = vadd.f32 %v909_v12, %v1995_v57 }
 0x1d5   : > { %v954_v15 = vmax.f32 %v845_v13, 0.0  ;;  %v955_v16 = vmax.f32 %v910_v14, 0.0 }
 0x1d7   : > { %1105 = vmatmul.f32.gmra.mxu2 %v954_v15  ;;  %1170 = vmatmul.f32.gmra.mxu3 %v955_v16 }
 0x1da   : > { %v847_v17 = vpop.f32.mrf.mxu0  ;;  %v912_v18 = vpop.f32.mrf.mxu1 }
 0x1db   : > { %v848_v19 = vadd.f32 %v847_v17, %v1993_v56  ;;  %v913_v20 = vadd.f32 %v912_v18, %v1995_v57 }
 0x1dd   : > { %v956_v23 = vmax.f32 %v848_v19, 0.0  ;;  %v957_v24 = vmax.f32 %v913_v20, 0.0 }
 0x1df   : > { %1108 = vmatmul.f32.gmra.mxu2 %v956_v23  ;;  %1173 = vmatmul.f32.gmra.mxu3 %v957_v24 }
 0x1e2   : > { %v850_v25 = vpop.f32.mrf.mxu0  ;;  %v915_v26 = vpop.f32.mrf.mxu1 }
 0x1e3   : > { %v851_v27 = vadd.f32 %v850_v25, %v1993_v56  ;;  %v916_v21 = vadd.f32 %v915_v26, %v1995_v57 }
 0x1e5   : > { %v958_v28 = vmax.f32 %v851_v27, 0.0  ;;  %v959_v29 = vmax.f32 %v916_v21, 0.0 }
 0x1e7   : > { %1111 = vmatmul.f32.gmra.mxu2 %v958_v28  ;;  %1176 = vmatmul.f32.gmra.mxu3 %v959_v29  ;;  %v2033_v28 = vld [vmem:[%s2113_s8] ss:$0 sm:$0xff] }
 0x1ea   : > { %v853_v30 = vpop.f32.mrf.mxu0  ;;  %v918_v31 = vpop.f32.mrf.mxu1 }
 0x1eb   : > { %v854_v32 = vadd.f32 %v853_v30, %v1993_v56  ;;  %v919_v33 = vadd.f32 %v918_v31, %v1995_v57 }
 0x1ed   : > { %v960_v34 = vmax.f32 %v854_v32, 0.0  ;;  %v961_v35 = vmax.f32 %v919_v33, 0.0 }
 0x1ef   : > { %1114 = vmatmul.f32.gmra.mxu2 %v960_v34  ;;  %1179 = vmatmul.f32.gmra.mxu3 %v961_v35 }
 0x1f2   : > { %v856_v36 = vpop.f32.mrf.mxu0  ;;  %v921_v37 = vpop.f32.mrf.mxu1 }
 0x1f3   : > { %v857_v38 = vadd.f32 %v856_v36, %v1993_v56  ;;  %v922_v39 = vadd.f32 %v921_v37, %v1995_v57 }
 0x1f5   : > { %v962_v40 = vmax.f32 %v857_v38, 0.0  ;;  %v963_v41 = vmax.f32 %v922_v39, 0.0 }
 0x1f7   : > { %1117 = vmatmul.f32.gmra.mxu2 %v962_v40  ;;  %1182 = vmatmul.f32.gmra.mxu3 %v963_v41 }
 0x1fa   : > { %v859_v42 = vpop.f32.mrf.mxu0  ;;  %v924_v43 = vpop.f32.mrf.mxu1 }
 0x1fb   : > { %v860_v44 = vadd.f32 %v859_v42, %v1993_v56  ;;  %v925_v45 = vadd.f32 %v924_v43, %v1995_v57 }
 0x1fd   : > { %v964_v46 = vmax.f32 %v860_v44, 0.0  ;;  %v965_v47 = vmax.f32 %v925_v45, 0.0 }
 0x1ff   : > { %1120 = vmatmul.f32.gmra.mxu2 %v964_v46  ;;  %1185 = vmatmul.f32.gmra.mxu3 %v965_v47 }
 0x202   : > { %v862_v48 = vpop.f32.mrf.mxu0  ;;  %v927_v49 = vpop.f32.mrf.mxu1 }
 0x203   : > { %v863_v50 = vadd.f32 %v862_v48, %v1993_v56  ;;  %v928_v51 = vadd.f32 %v927_v49, %v1995_v57 }
 0x205   : > { %v966_v52 = vmax.f32 %v863_v50, 0.0  ;;  %v967_v53 = vmax.f32 %v928_v51, 0.0 }
 0x207   : > { %1123 = vmatmul.f32.gmra.mxu2 %v966_v52  ;;  %1188 = vmatmul.f32.gmra.mxu3 %v967_v53 }
 0x20a   : > { %v865_v54 = vpop.f32.mrf.mxu0  ;;  %v930_v55 = vpop.f32.mrf.mxu1 }
 0x20b   : > { %v866_v58 = vadd.f32 %v865_v54, %v1993_v56  ;;  %v931_v59 = vadd.f32 %v930_v55, %v1995_v57 }
 0x20d   : > { %v968_v60 = vmax.f32 %v866_v58, 0.0  ;;  %v969_v61 = vmax.f32 %v931_v59, 0.0 }
 0x20f   : > { %1126 = vmatmul.f32.gmra.mxu2 %v968_v60  ;;  %1191 = vmatmul.f32.gmra.mxu3 %v969_v61 }
 0x212   : > { %v868_v62 = vpop.f32.mrf.mxu0  ;;  %v933_v63 = vpop.f32.mrf.mxu1 }
 0x213   : > { %v869_v22 = vadd.f32 %v868_v62, %v1993_v56  ;;  %v934_v0 = vadd.f32 %v933_v63, %v1995_v57 }
 0x215   : > { %v970_v1 = vmax.f32 %v869_v22, 0.0  ;;  %v971_v2 = vmax.f32 %v934_v0, 0.0 }
 0x217   : > { %1129 = vmatmul.f32.gmra.mxu2 %v970_v1  ;;  %1194 = vmatmul.f32.gmra.mxu3 %v971_v2 }
 0x21a   : > { %v871_v3 = vpop.f32.mrf.mxu0  ;;  %v936_v4 = vpop.f32.mrf.mxu1 }
 0x21b   : > { %v872_v5 = vadd.f32 %v871_v3, %v1993_v56  ;;  %v937_v6 = vadd.f32 %v936_v4, %v1995_v57 }
 0x21d   : > { %v972_v7 = vmax.f32 %v872_v5, 0.0  ;;  %v973_v8 = vmax.f32 %v937_v6, 0.0 }
 0x21f   : > { %1132 = vmatmul.f32.gmra.mxu2 %v972_v7  ;;  %1197 = vmatmul.f32.gmra.mxu3 %v973_v8 }
 0x222   : > { %v874_v9 = vpop.f32.mrf.mxu0  ;;  %v939_v10 = vpop.f32.mrf.mxu1 }
 0x223   : > { %v875_v11 = vadd.f32 %v874_v9, %v1993_v56  ;;  %v940_v12 = vadd.f32 %v939_v10, %v1995_v57 }
 0x225   : > { %v974_v13 = vmax.f32 %v875_v11, 0.0  ;;  %v975_v14 = vmax.f32 %v940_v12, 0.0 }
 0x227   : > { %1135 = vmatmul.f32.gmra.mxu2 %v974_v13  ;;  %1200 = vmatmul.f32.gmra.mxu3 %v975_v14 }
 0x22a   : > { %v877_v15 = vpop.f32.mrf.mxu0  ;;  %v942_v16 = vpop.f32.mrf.mxu1 }
 0x22b   : > { %v878_v17 = vadd.f32 %v877_v15, %v1993_v56  ;;  %v943_v18 = vadd.f32 %v942_v16, %v1995_v57 }
 0x22d   : > { %v976_v19 = vmax.f32 %v878_v17, 0.0  ;;  %v977_v20 = vmax.f32 %v943_v18, 0.0 }
 0x22f   : > { %1138 = vmatmul.f32.gmra.mxu2 %v976_v19  ;;  %1203 = vmatmul.f32.gmra.mxu3 %v977_v20 }
 0x232   : > { %v880_v23 = vpop.f32.mrf.mxu0  ;;  %v945_v24 = vpop.f32.mrf.mxu1 }
 0x233   : > { %v881_v25 = vadd.f32 %v880_v23, %v1993_v56  ;;  %v946_v26 = vadd.f32 %v945_v24, %v1995_v57 }
 0x235   : > { %v978_v27 = vmax.f32 %v881_v25, 0.0  ;;  %v979_v21 = vmax.f32 %v946_v26, 0.0 }
 0x237   : > { %1141 = vmatmul.f32.gmra.mxu2 %v978_v27  ;;  %1206 = vmatmul.f32.gmra.mxu3 %v979_v21 }
 0x242   : > { %v1097_v29 = vpop.f32.mrf.mxu2  ;;  %v1162_v30 = vpop.f32.mrf.mxu3 }
 0x243   : > { %v1098_v31 = vadd.f32 %v2033_v28, %v1097_v29 }
 0x245   : > { %v1163_v32 = vadd.f32 %v1162_v30, %v1098_v31 }
 0x247   : > { %1210 = vst [vmem:[%s2038_s24] sm:$0xff] %v1163_v32 }
 0x24a   : > { %v1100_v56 = vpop.f32.mrf.mxu2  ;;  %v1165_v57 = vpop.f32.mrf.mxu3 }
 0x24b   : > { %v1101_v33 = vadd.f32 %v2033_v28, %v1100_v56 }
 0x24d   : > { %v1166_v34 = vadd.f32 %v1165_v57, %v1101_v33 }
 0x24f   : > { %1211 = vst [vmem:[%s2038_s24 + $0x8] sm:$0xff] %v1166_v34 }
 0x252   : > { %v1103_v35 = vpop.f32.mrf.mxu2  ;;  %v1168_v36 = vpop.f32.mrf.mxu3 }
 0x253   : > { %v1104_v37 = vadd.f32 %v2033_v28, %v1103_v35 }
 0x255   : > { %v1169_v38 = vadd.f32 %v1168_v36, %v1104_v37 }
 0x257   : > { %1212 = vst [vmem:[%s2038_s24 + $0x10] sm:$0xff] %v1169_v38 }
 0x25a   : > { %v1106_v39 = vpop.f32.mrf.mxu2  ;;  %v1171_v40 = vpop.f32.mrf.mxu3 }
 0x25b   : > { %v1107_v41 = vadd.f32 %v2033_v28, %v1106_v39 }
 0x25d   : > { %v1172_v42 = vadd.f32 %v1171_v40, %v1107_v41 }
 0x25f   : > { %1213 = vst [vmem:[%s2038_s24 + $0x18] sm:$0xff] %v1172_v42 }
 0x262   : > { %v1109_v43 = vpop.f32.mrf.mxu2  ;;  %v1174_v44 = vpop.f32.mrf.mxu3 }
 0x263   : > { %v1110_v45 = vadd.f32 %v2033_v28, %v1109_v43 }
 0x265   : > { %v1175_v46 = vadd.f32 %v1174_v44, %v1110_v45 }
 0x267   : > { %1214 = vst [vmem:[%s2038_s24 + $0x20] sm:$0xff] %v1175_v46 }
 0x26a   : > { %v1112_v47 = vpop.f32.mrf.mxu2  ;;  %v1177_v48 = vpop.f32.mrf.mxu3 }
 0x26b   : > { %v1113_v49 = vadd.f32 %v2033_v28, %v1112_v47 }
 0x26d   : > { %v1178_v50 = vadd.f32 %v1177_v48, %v1113_v49 }
 0x26f   : > { %1215 = vst [vmem:[%s2038_s24 + $0x28] sm:$0xff] %v1178_v50 }
 0x272   : > { %v1115_v51 = vpop.f32.mrf.mxu2  ;;  %v1180_v52 = vpop.f32.mrf.mxu3 }
 0x273   : > { %v1116_v53 = vadd.f32 %v2033_v28, %v1115_v51 }
 0x275   : > { %v1181_v54 = vadd.f32 %v1180_v52, %v1116_v53 }
 0x277   : > { %1216 = vst [vmem:[%s2038_s24 + $0x30] sm:$0xff] %v1181_v54 }
 0x27a   : > { %v1118_v55 = vpop.f32.mrf.mxu2  ;;  %v1183_v58 = vpop.f32.mrf.mxu3 }
 0x27b   : > { %v1119_v59 = vadd.f32 %v2033_v28, %v1118_v55 }
 0x27d   : > { %v1184_v60 = vadd.f32 %v1183_v58, %v1119_v59 }
 0x27f   : > { %1217 = vst [vmem:[%s2038_s24 + $0x38] sm:$0xff] %v1184_v60 }
 0x282   : > { %v1121_v61 = vpop.f32.mrf.mxu2  ;;  %v1186_v62 = vpop.f32.mrf.mxu3 }
 0x283   : > { %v1122_v63 = vadd.f32 %v2033_v28, %v1121_v61 }
 0x285   : > { %v1187_v22 = vadd.f32 %v1186_v62, %v1122_v63 }
 0x287   : > { %1218 = vst [vmem:[%s2038_s24 + $0x40] sm:$0xff] %v1187_v22 }
 0x28a   : > { %v1124_v0 = vpop.f32.mrf.mxu2  ;;  %v1189_v1 = vpop.f32.mrf.mxu3 }
 0x28b   : > { %v1125_v2 = vadd.f32 %v2033_v28, %v1124_v0 }
 0x28d   : > { %v1190_v3 = vadd.f32 %v1189_v1, %v1125_v2 }
 0x28f   : > { %1219 = vst [vmem:[%s2038_s24 + $0x48] sm:$0xff] %v1190_v3 }
 0x292   : > { %v1127_v4 = vpop.f32.mrf.mxu2  ;;  %v1192_v5 = vpop.f32.mrf.mxu3 }
 0x293   : > { %v1128_v6 = vadd.f32 %v2033_v28, %v1127_v4 }
 0x295   : > { %v1193_v7 = vadd.f32 %v1192_v5, %v1128_v6 }
 0x297   : > { %1220 = vst [vmem:[%s2038_s24 + $0x50] sm:$0xff] %v1193_v7 }
 0x29a   : > { %v1130_v8 = vpop.f32.mrf.mxu2  ;;  %v1195_v9 = vpop.f32.mrf.mxu3 }
 0x29b   : > { %v1131_v10 = vadd.f32 %v2033_v28, %v1130_v8 }
 0x29d   : > { %v1196_v11 = vadd.f32 %v1195_v9, %v1131_v10 }
 0x29f   : > { %1221 = vst [vmem:[%s2038_s24 + $0x58] sm:$0xff] %v1196_v11 }
 0x2a2   : > { %v1133_v12 = vpop.f32.mrf.mxu2  ;;  %v1198_v13 = vpop.f32.mrf.mxu3 }
 0x2a3   : > { %v1134_v14 = vadd.f32 %v2033_v28, %v1133_v12 }
 0x2a5   : > { %v1199_v15 = vadd.f32 %v1198_v13, %v1134_v14 }
 0x2a7   : > { %1222 = vst [vmem:[%s2038_s24 + $0x60] sm:$0xff] %v1199_v15 }
 0x2aa   : > { %v1136_v16 = vpop.f32.mrf.mxu2  ;;  %v1201_v17 = vpop.f32.mrf.mxu3 }
 0x2ab   : > { %v1137_v18 = vadd.f32 %v2033_v28, %v1136_v16 }
 0x2ad   : > { %v1202_v19 = vadd.f32 %v1201_v17, %v1137_v18 }
 0x2af   : > { %1223 = vst [vmem:[%s2038_s24 + $0x68] sm:$0xff] %v1202_v19 }
 0x2b2   : > { %v1139_v20 = vpop.f32.mrf.mxu2  ;;  %v1204_v23 = vpop.f32.mrf.mxu3 }
 0x2b3   : > { %v1140_v24 = vadd.f32 %v2033_v28, %v1139_v20 }
 0x2b5   : > { %v1205_v25 = vadd.f32 %v1204_v23, %v1140_v24 }
 0x2b7   : > { %1224 = vst [vmem:[%s2038_s24 + $0x70] sm:$0xff] %v1205_v25 }
 0x2ba   : > { %v1142_v26 = vpop.f32.mrf.mxu2  ;;  %v1207_v21 = vpop.f32.mrf.mxu3 }
 0x2bb   : > { %v1143_v27 = vadd.f32 %v2033_v28, %v1142_v26 }
 0x2bd   : > { %v1208_v29 = vadd.f32 %v1207_v21, %v1143_v27 }
 0x2bf   : > { %1225 = vst [vmem:[%s2038_s24 + $0x78] sm:$0xff] %v1208_v29 }
 0x2c0   : > { %1387 = shalt.err (!%p1384_p3)
}
 0x2c1   : > { %s1424_s26 = smov 128   ;;  %s1425_s24 = smov 8  }
 0x2c2   : > { %1317 = dma.vmem_to_hbm [thread:$0]  (%p1514_p5), %s1240_s16, 2048, %s1242_s17, %s1227_s27, %s1424_s26, %s1424_s26, %s1425_s24  }
 0x2c3 PF: > { %p1323_p4 = scmp.ge.s32.totalorder %s1422_s12, 2  ;;  %s1256_s14 = sand.u32 1, %s1410_s30  }
 0x2c4   : > { %s1257_s22 = scalar_lea.sflag [#allocation5], %s1256_s14 }
 0x2c5   : > { %p1320_p7 = pnand %p1323_p4, %p1518_p6 }
 0x2c7   : > { %p1321_p8 = pneg %p1320_p7 }
 0x2c9   : > { %1405 = dma.done.wait (%p1321_p8), %s1257_s22, 2048  }
 0x2ca   : > { %1407 = vsyncadd (%p1321_p8), %s1257_s22, 4294965248  ;;  %p19_p9 = scmp.ge.s32.totalorder %s1501_s15, 4   ;;  %s2117_s30 = smov %s1414_s10 }
 0x2cb   : > { %s2118_s10 = smov %s1418_s11  ;;  %s2119_s11 = smov %s1512_s18 }
 0x2cc   : > { %s2120_s12 = smov %s1501_s15  ;;  %21 = sbr.rel (!%p19_p9) target bundleno = 3 (0x3), region = 91 }
 0x2d1   :  { %1263 = vsyncpa [#allocation5], 1 }
 0x2d2   :  { %1265 = vsyncpa [#allocation5 + $0x1], 1 }

</bundles_post_ra>
